<compile_context>
chip_gen: v5e
topology: v5e:2x2
jax: 0.10.0
libtpu: 0.0.40
codegen_flags: <defaults>
</compile_context>

<pallas_src>
import functools

import jax
import jax.numpy as jnp
from jax import lax
from jax.experimental import pallas as pl
from jax.experimental.pallas import tpu as pltpu

OUT_LANES = 128   # lane-dense packed output width (tiny-batch latency regime)
IN_LANES = 128    # lane-dense packed per-call input width
VEC_ROWS = 8      # rows of the small f32 vector-parameter slab


def _rup(x, m):
    return (x + m - 1) // m * m


def _input_offsets(E, D):
    """Lane offsets inside the per-call (B, IN_LANES) f32 input slab."""
    off_qr = 0
    off_u = 2 * E
    off_noise = _rup(2 * E + 1, 8)
    off_pmu = off_noise + _rup(D, 8)
    off_ipv = off_pmu + _rup(D, 8)
    return off_qr, off_u, off_noise, off_pmu, off_ipv


def _wslab_rows(E, H, D):
    """Row offsets inside the fused bf16 weight slab (16-aligned for bf16 tiles)."""
    H2 = H // 2
    r_w1 = 0
    r_w2 = r_w1 + _rup(2 * E, 16)
    r_mulv = r_w2 + _rup(H, 16)
    r_pv1 = r_mulv + _rup(H2, 16)
    r_end = r_pv1 + _rup(D, 16)
    return r_w1, r_w2, r_mulv, r_pv1, r_end


def rbs_kernel(in_ref, w_ref, v_ref, out_ref, *, E, H, D):
    f32 = jnp.float32
    bf16 = jnp.bfloat16
    H2, H4 = H // 2, H // 4
    B = out_ref.shape[0]

    _, off_u, off_noise, off_pmu, off_ipv = _input_offsets(E, D)
    r_w1, r_w2, r_mulv, r_pv1, _ = _wslab_rows(E, H, D)

    # ---- per-call input slab slices -----------------------------------------
    qr = in_ref[:, 0:2 * E].astype(bf16)                   # (B, 2E)
    u = in_ref[:, off_u:off_u + 1]                         # (B, 1) f32
    noise = in_ref[:, off_noise:off_noise + D]             # (B, D)
    pmu = in_ref[:, off_pmu:off_pmu + D]                   # (B, D) prior mean
    ipv = in_ref[:, off_ipv:off_ipv + D]                   # (B, D) exp(-prior_logvar)

    # ---- static parameter slices (bf16 weight slab / f32 vector slab) -------
    w1qr = w_ref[r_w1:r_w1 + 2 * E, 0:H]                   # (2E, H)   bf16
    w2 = w_ref[r_w2:r_w2 + H, 0:H2]                        # (H, H/2)  bf16
    wmulv = w_ref[r_mulv:r_mulv + H2, 0:2 * D]             # (H/2, 2D) bf16
    wpv1 = w_ref[r_pv1:r_pv1 + D, 0:H2]                    # (D, H/2)  bf16

    w1u = v_ref[0:1, 0:H]                                  # (1, H)  f32
    b1 = v_ref[1:2, 0:H]
    b2 = v_ref[2:3, 0:H2]
    bmulv = v_ref[3:4, 0:2 * D]
    bpv1 = v_ref[4:5, 0:H2]
    wdiff = v_ref[5:6, 0:H4]                               # wp2[:,1] - wp2[:,0]
    wv2 = v_ref[5:6, H4:2 * H4]
    bdiff = v_ref[5:6, 2 * H4:2 * H4 + 1]                  # (1, 1)
    bv2 = v_ref[5:6, 2 * H4 + 1:2 * H4 + 2]                # (1, 1)

    # ---- state encoder (q|r on the MXU; u column on the VPU) ----------------
    h = jnp.dot(qr, w1qr, preferred_element_type=f32) + u * w1u + b1
    h = jnp.maximum(h, 0.0)                                # (B, H)
    h = jnp.maximum(
        jnp.dot(h.astype(bf16), w2, preferred_element_type=f32) + b2, 0.0)  # (B, H/2)

    # ---- fused belief_mean | belief_logvar head ------------------------------
    mulv = jnp.dot(h.astype(bf16), wmulv, preferred_element_type=f32) + bmulv
    mu = mulv[:, :D]
    logvar = mulv[:, D:]

    # ---- recursive Bayesian belief update (f32; exact divide for recurrent
    #      state; rsqrt replaces exp(0.5*new_logvar) exactly) ------------------
    inv_var = jnp.exp(-logvar)
    precision = inv_var + ipv
    new_lv = -jnp.log(precision + 1e-8)
    new_mu = (mu * inv_var + pmu * ipv) / precision
    sample = new_mu + noise * lax.rsqrt(precision + 1e-8)

    # ---- fused policy|value first layer (MXU) ---------------------------------
    hpv = jnp.maximum(
        jnp.dot(sample.astype(bf16), wpv1, preferred_element_type=f32) + bpv1, 0.0)

    # ---- tail N=3 head on the VPU/XLU (no trailing MXU push/pop) --------------
    hp = hpv[:, :H4]
    hv = hpv[:, H4:]
    logit_diff = jnp.sum(hp * wdiff, axis=-1, keepdims=True) + bdiff   # = l1 - l0
    value = jnp.sum(hv * wv2, axis=-1, keepdims=True) + bv2

    # 2-class softmax == sigmoid of the logit difference (exact identity);
    # approx reciprocal only here, never in the recurrent belief state.
    p1 = pl.reciprocal(1.0 + jnp.exp(-logit_diff), approx=True)
    p0 = 1.0 - p1

    # ---- single lane-dense packed store ---------------------------------------
    pad = jnp.zeros((B, out_ref.shape[1] - (3 + 2 * D)), f32)
    out_ref[...] = jnp.concatenate([p0, p1, value, new_mu, new_lv, pad], axis=-1)


def make_params(key, embedding_dim, hidden_dim, belief_dim):
    """Synthetic per-layer parameters mirroring the PyTorch module; weights are (in, out)."""
    input_dim = embedding_dim * 2 + 1
    dims = [
        ("w1", (input_dim, hidden_dim)), ("b1", (1, hidden_dim)),
        ("w2", (hidden_dim, hidden_dim // 2)), ("b2", (1, hidden_dim // 2)),
        ("wmu", (hidden_dim // 2, belief_dim)), ("bmu", (1, belief_dim)),
        ("wlv", (hidden_dim // 2, belief_dim)), ("blv", (1, belief_dim)),
        ("wp1", (belief_dim, hidden_dim // 4)), ("bp1", (1, hidden_dim // 4)),
        ("wp2", (hidden_dim // 4, 2)), ("bp2", (1, 2)),
        ("wv1", (belief_dim, hidden_dim // 4)), ("bv1", (1, hidden_dim // 4)),
        ("wv2", (hidden_dim // 4, 1)), ("bv2", (1, 1)),
    ]
    params = {}
    keys = jax.random.split(key, len(dims))
    for (name, shape), k in zip(dims, keys):
        params[name] = (0.1 * jax.random.normal(k, shape)).astype(jnp.float32)
    return params


def fuse_params(params):
    """Build kernel-ready fused slabs once, outside the kernel (one DMA each)."""
    f32, bf16 = jnp.float32, jnp.bfloat16
    w1 = params["w1"]
    E = (w1.shape[0] - 1) // 2
    H = w1.shape[1]
    D = params["wmu"].shape[1]
    H2, H4 = H // 2, H // 4
    assert params["w2"].shape == (H, H2) and params["wp2"].shape == (H4, 2)
    assert max(H, H2, 2 * D, 2 * H4 + 2) <= 128

    r_w1, r_w2, r_mulv, r_pv1, r_end = _wslab_rows(E, H, D)

    wslab = jnp.zeros((r_end, 128), f32)
    wslab = wslab.at[r_w1:r_w1 + 2 * E, 0:H].set(w1[:2 * E])          # layer-1 (q|r)
    wslab = wslab.at[r_w2:r_w2 + H, 0:H2].set(params["w2"])
    wslab = wslab.at[r_mulv:r_mulv + H2, 0:D].set(params["wmu"])
    wslab = wslab.at[r_mulv:r_mulv + H2, D:2 * D].set(params["wlv"])
    wslab = wslab.at[r_pv1:r_pv1 + D, 0:H4].set(params["wp1"])
    wslab = wslab.at[r_pv1:r_pv1 + D, H4:2 * H4].set(params["wv1"])
    wslab = wslab.astype(bf16)

    vslab = jnp.zeros((VEC_ROWS, 128), f32)
    vslab = vslab.at[0, 0:H].set(w1[2 * E])                            # u column of W1
    vslab = vslab.at[1, 0:H].set(params["b1"][0])
    vslab = vslab.at[2, 0:H2].set(params["b2"][0])
    vslab = vslab.at[3, 0:D].set(params["bmu"][0])
    vslab = vslab.at[3, D:2 * D].set(params["blv"][0])
    vslab = vslab.at[4, 0:H4].set(params["bp1"][0])
    vslab = vslab.at[4, H4:2 * H4].set(params["bv1"][0])
    vslab = vslab.at[5, 0:H4].set(params["wp2"][:, 1] - params["wp2"][:, 0])
    vslab = vslab.at[5, H4:2 * H4].set(params["wv2"][:, 0])
    vslab = vslab.at[5, 2 * H4].set(params["bp2"][0, 1] - params["bp2"][0, 0])
    vslab = vslab.at[5, 2 * H4 + 1].set(params["bv2"][0, 0])

    return dict(wslab=wslab, vslab=vslab, E=E, H=H, D=D)


def rbs_forward(query_emb, result_emb, uncertainty, fused, noise, prev_belief=None):
    """JAX wrapper: pack one per-call input slab, one pallas_call, slice the output slab."""
    f32 = jnp.float32
    B, E = query_emb.shape
    D = noise.shape[1]
    H = fused["H"]
    assert fused["E"] == E and fused["D"] == D

    if prev_belief is None:
        prior_mu = jnp.zeros((1, D), f32)     # torch.zeros(1, belief_dim)
        prior_lv = jnp.ones((1, D), f32)      # torch.ones(1, belief_dim)
    else:
        prior_mu, prior_lv = prev_belief
    inv_prev_var = jnp.exp(-prior_lv.astype(f32))   # per-call constant, hoisted off the EUP chain

    _, off_u, off_noise, off_pmu, off_ipv = _input_offsets(E, D)
    used = off_ipv + D
    assert used <= IN_LANES and 3 + 2 * D <= OUT_LANES

    def z(n):
        return jnp.zeros((B, n), f32)

    in_slab = jnp.concatenate([
        query_emb.astype(f32), result_emb.astype(f32),
        uncertainty.astype(f32)[:, None],
        z(off_noise - (2 * E + 1)), noise.astype(f32),
        z(off_pmu - (off_noise + D)), jnp.broadcast_to(prior_mu.astype(f32), (B, D)),
        z(off_ipv - (off_pmu + D)), jnp.broadcast_to(inv_prev_var, (B, D)),
        z(IN_LANES - used)], axis=-1)

    # Batch grid: single step at demo size; for production batches pick a tile >= 256
    # (multiple of 8) so per-step overhead amortizes. Weight/vector slabs stay
    # VMEM-resident via constant index_maps; the axis is 'parallel' for megacore/v7x.
    TB = B if B <= 512 else 512
    grid = (pl.cdiv(B, TB),)

    wslab, vslab = fused["wslab"], fused["vslab"]
    kernel = functools.partial(rbs_kernel, E=E, H=H, D=D)

    slab = pl.pallas_call(
        kernel,
        out_shape=jax.ShapeDtypeStruct((B, OUT_LANES), f32),
        grid=grid,
        in_specs=[
            pl.BlockSpec((TB, IN_LANES), lambda i: (i, 0)),
            pl.BlockSpec(wslab.shape, lambda i: (0, 0)),   # resident bf16 weights
            pl.BlockSpec(vslab.shape, lambda i: (0, 0)),   # resident f32 biases/vectors
        ],
        out_specs=pl.BlockSpec((TB, OUT_LANES), lambda i: (i, 0)),
        compiler_params=pltpu.CompilerParams(
            dimension_semantics=("parallel",)),
    )(in_slab, wslab, vslab)

    probs = slab[:, 0:2]
    value = slab[:, 2:3]
    belief_mu = slab[:, 3:3 + D]
    belief_lv = slab[:, 3 + D:3 + 2 * D]
    return probs, value, (belief_mu, belief_lv)


def rbs_reference(query_emb, result_emb, uncertainty, params, noise,
                  prev_belief=None, belief_dim=8):
    """Pure-JAX f32 reference of the PyTorch forward (unfused params)."""
    state = jnp.concatenate([query_emb, result_emb, uncertainty[:, None]], axis=-1)
    h = jax.nn.relu(state @ params["w1"] + params["b1"])
    h = jax.nn.relu(h @ params["w2"] + params["b2"])
    mu = h @ params["wmu"] + params["bmu"]
    logvar = h @ params["wlv"] + params["blv"]
    if prev_belief is None:
        prev_mu = jnp.zeros((1, belief_dim), jnp.float32)
        prev_lv = jnp.ones((1, belief_dim), jnp.float32)
    else:
        prev_mu, prev_lv = prev_belief
    precision = jnp.exp(-logvar) + jnp.exp(-prev_lv)
    new_lv = -jnp.log(precision + 1e-8)
    new_mu = (mu * jnp.exp(-logvar) + prev_mu * jnp.exp(-prev_lv)) / precision
    sample = new_mu + noise * jnp.exp(0.5 * new_lv)
    hp = jax.nn.relu(sample @ params["wp1"] + params["bp1"])
    probs = jax.nn.softmax(hp @ params["wp2"] + params["bp2"], axis=-1)
    hv = jax.nn.relu(sample @ params["wv1"] + params["bv1"])
    value = hv @ params["wv2"] + params["bv2"]
    return probs, value, (new_mu, new_lv)


if __name__ == "__main__":
    # Small shapes consistent with the module's forward pass.
    B, E, H, D = 8, 16, 32, 8   # batch, embedding_dim, hidden_dim, belief_dim

    key = jax.random.PRNGKey(0)
    k_q, k_r, k_u, k_n, k_p = jax.random.split(key, 5)

    query_emb = jax.random.normal(k_q, (B, E), jnp.float32)
    result_emb = jax.random.normal(k_r, (B, E), jnp.float32)
    uncertainty = jax.random.uniform(k_u, (B,), jnp.float32)
    # reparameterization noise (replaces torch.randn_like inside forward)
    noise = jax.random.normal(k_n, (B, D), jnp.float32)

    params = make_params(k_p, E, H, D)
    fused = fuse_params(params)

    probs, value, belief = rbs_forward(query_emb, result_emb, uncertainty, fused, noise)
    jax.block_until_ready((probs, value, belief))

    # Shape / finiteness checks
    assert probs.shape == (B, 2) and value.shape == (B, 1)
    assert belief[0].shape == (B, D) and belief[1].shape == (B, D)
    assert bool(jnp.all(jnp.isfinite(probs)))
    assert bool(jnp.all(jnp.isfinite(value)))

    # Step 1 vs f32 reference (bf16 matmuls + approx sigmoid reciprocal -> loose tol)
    rp, rv, (rmu, rlv) = rbs_reference(
        query_emb, result_emb, uncertainty, params, noise, belief_dim=D)
    assert bool(jnp.allclose(probs, rp, atol=5e-2, rtol=5e-2))
    assert bool(jnp.allclose(value, rv, atol=5e-2, rtol=5e-2))
    assert bool(jnp.allclose(belief[0], rmu, atol=5e-2, rtol=5e-2))
    assert bool(jnp.allclose(belief[1], rlv, atol=5e-2, rtol=5e-2))

    # Step 2: recursive use of the belief state (exact divide keeps it stable)
    probs2, value2, belief2 = rbs_forward(
        query_emb, result_emb, uncertainty, fused, noise, prev_belief=belief)
    jax.block_until_ready((probs2, value2, belief2))
    rp2, rv2, (rmu2, rlv2) = rbs_reference(
        query_emb, result_emb, uncertainty, params, noise,
        prev_belief=(rmu, rlv), belief_dim=D)
    assert bool(jnp.allclose(probs2, rp2, atol=5e-2, rtol=5e-2))
    assert bool(jnp.allclose(value2, rv2, atol=5e-2, rtol=5e-2))
    assert bool(jnp.allclose(belief2[0], rmu2, atol=5e-2, rtol=5e-2))
    assert bool(jnp.allclose(belief2[1], rlv2, atol=5e-2, rtol=5e-2))

    print("KERNEL_OK")
</pallas_src>

<mosaic_0001>
module attributes {stable_mosaic.version = 11 : i64} {
  func.func @rbs_kernel(%arg0: i32, %arg1: memref<8x128xf32, #tpu.memory_space<vmem>>, %arg2: memref<96x128xbf16, #tpu.memory_space<vmem>>, %arg3: memref<8x128xf32, #tpu.memory_space<vmem>>, %arg4: memref<8x128xf32, #tpu.memory_space<vmem>>) attributes {dimension_semantics = [#tpu.dimension_semantics<parallel>], iteration_bounds = array<i64: 1>, scalar_prefetch = 0 : i64, scratch_operands = 0 : i64, tpu.core_type = #tpu.core_type<tc>, window_params = [{transform_indices = @transform_0, window_bounds = array<i64: 8, 128>}, {pipeline_mode = #tpu.pipeline_mode<synchronous>, transform_indices = @transform_1, window_bounds = array<i64: 96, 128>}, {pipeline_mode = #tpu.pipeline_mode<synchronous>, transform_indices = @transform_2, window_bounds = array<i64: 8, 128>}, {transform_indices = @transform_3, window_bounds = array<i64: 8, 128>}]} {
    %c0 = arith.constant 0 : index
    %c0_0 = arith.constant 0 : index
    %0 = vector.load %arg1[%c0, %c0_0] : memref<8x128xf32, #tpu.memory_space<vmem>>, vector<8x32xf32>
    %1 = arith.truncf %0 : vector<8x32xf32> to vector<8x32xbf16>
    %c0_1 = arith.constant 0 : index
    %c32 = arith.constant 32 : index
    %2 = vector.load %arg1[%c0_1, %c32] : memref<8x128xf32, #tpu.memory_space<vmem>>, vector<8x1xf32>
    %c0_2 = arith.constant 0 : index
    %c40 = arith.constant 40 : index
    %3 = vector.load %arg1[%c0_2, %c40] : memref<8x128xf32, #tpu.memory_space<vmem>>, vector<8x8xf32>
    %c0_3 = arith.constant 0 : index
    %c48 = arith.constant 48 : index
    %4 = vector.load %arg1[%c0_3, %c48] : memref<8x128xf32, #tpu.memory_space<vmem>>, vector<8x8xf32>
    %c0_4 = arith.constant 0 : index
    %c56 = arith.constant 56 : index
    %5 = vector.load %arg1[%c0_4, %c56] : memref<8x128xf32, #tpu.memory_space<vmem>>, vector<8x8xf32>
    %c0_5 = arith.constant 0 : index
    %c0_6 = arith.constant 0 : index
    %6 = vector.load %arg2[%c0_5, %c0_6] : memref<96x128xbf16, #tpu.memory_space<vmem>>, vector<32x32xbf16>
    %c32_7 = arith.constant 32 : index
    %c0_8 = arith.constant 0 : index
    %7 = vector.load %arg2[%c32_7, %c0_8] : memref<96x128xbf16, #tpu.memory_space<vmem>>, vector<32x16xbf16>
    %c64 = arith.constant 64 : index
    %c0_9 = arith.constant 0 : index
    %8 = vector.load %arg2[%c64, %c0_9] : memref<96x128xbf16, #tpu.memory_space<vmem>>, vector<16x16xbf16>
    %c80 = arith.constant 80 : index
    %c0_10 = arith.constant 0 : index
    %9 = vector.load %arg2[%c80, %c0_10] : memref<96x128xbf16, #tpu.memory_space<vmem>>, vector<8x16xbf16>
    %c0_11 = arith.constant 0 : index
    %c0_12 = arith.constant 0 : index
    %10 = vector.load %arg3[%c0_11, %c0_12] : memref<8x128xf32, #tpu.memory_space<vmem>>, vector<1x32xf32>
    %c1 = arith.constant 1 : index
    %c0_13 = arith.constant 0 : index
    %11 = vector.load %arg3[%c1, %c0_13] : memref<8x128xf32, #tpu.memory_space<vmem>>, vector<1x32xf32>
    %c2 = arith.constant 2 : index
    %c0_14 = arith.constant 0 : index
    %12 = vector.load %arg3[%c2, %c0_14] : memref<8x128xf32, #tpu.memory_space<vmem>>, vector<1x16xf32>
    %c3 = arith.constant 3 : index
    %c0_15 = arith.constant 0 : index
    %13 = vector.load %arg3[%c3, %c0_15] : memref<8x128xf32, #tpu.memory_space<vmem>>, vector<1x16xf32>
    %c4 = arith.constant 4 : index
    %c0_16 = arith.constant 0 : index
    %14 = vector.load %arg3[%c4, %c0_16] : memref<8x128xf32, #tpu.memory_space<vmem>>, vector<1x16xf32>
    %c5 = arith.constant 5 : index
    %c0_17 = arith.constant 0 : index
    %15 = vector.load %arg3[%c5, %c0_17] : memref<8x128xf32, #tpu.memory_space<vmem>>, vector<1x8xf32>
    %c5_18 = arith.constant 5 : index
    %c8 = arith.constant 8 : index
    %16 = vector.load %arg3[%c5_18, %c8] : memref<8x128xf32, #tpu.memory_space<vmem>>, vector<1x8xf32>
    %c5_19 = arith.constant 5 : index
    %c16 = arith.constant 16 : index
    %17 = vector.load %arg3[%c5_19, %c16] : memref<8x128xf32, #tpu.memory_space<vmem>>, vector<1x1xf32>
    %c5_20 = arith.constant 5 : index
    %c17 = arith.constant 17 : index
    %18 = vector.load %arg3[%c5_20, %c17] : memref<8x128xf32, #tpu.memory_space<vmem>>, vector<1x1xf32>
    %cst = arith.constant dense<0.000000e+00> : vector<8x32xf32>
    %19 = tpu.matmul %1, %6, %cst {dimension_numbers = #tpu.dot_dimension_numbers<[1], [0], [0], [1], [0, 0, 1, 1], [], []>} : vector<8x32xbf16>, vector<32x32xbf16>, vector<8x32xf32> -> vector<8x32xf32>
    %20 = vector.broadcast %2 : vector<8x1xf32> to vector<8x32xf32>
    %21 = vector.broadcast %10 : vector<1x32xf32> to vector<8x32xf32>
    %22 = arith.mulf %20, %21 : vector<8x32xf32>
    %23 = arith.addf %19, %22 : vector<8x32xf32>
    %24 = vector.broadcast %11 : vector<1x32xf32> to vector<8x32xf32>
    %25 = arith.addf %23, %24 : vector<8x32xf32>
    %cst_21 = arith.constant 0.000000e+00 : f32
    %26 = vector.broadcast %cst_21 : f32 to vector<8x32xf32>
    %27 = arith.maximumf %25, %26 : vector<8x32xf32>
    %28 = arith.truncf %27 : vector<8x32xf32> to vector<8x32xbf16>
    %cst_22 = arith.constant dense<0.000000e+00> : vector<8x16xf32>
    %29 = tpu.matmul %28, %7, %cst_22 {dimension_numbers = #tpu.dot_dimension_numbers<[1], [0], [0], [1], [0, 0, 1, 1], [], []>} : vector<8x32xbf16>, vector<32x16xbf16>, vector<8x16xf32> -> vector<8x16xf32>
    %30 = vector.broadcast %12 : vector<1x16xf32> to vector<8x16xf32>
    %31 = arith.addf %29, %30 : vector<8x16xf32>
    %cst_23 = arith.constant 0.000000e+00 : f32
    %32 = vector.broadcast %cst_23 : f32 to vector<8x16xf32>
    %33 = arith.maximumf %31, %32 : vector<8x16xf32>
    %34 = arith.truncf %33 : vector<8x16xf32> to vector<8x16xbf16>
    %cst_24 = arith.constant dense<0.000000e+00> : vector<8x16xf32>
    %35 = tpu.matmul %34, %8, %cst_24 {dimension_numbers = #tpu.dot_dimension_numbers<[1], [0], [0], [1], [0, 0, 1, 1], [], []>} : vector<8x16xbf16>, vector<16x16xbf16>, vector<8x16xf32> -> vector<8x16xf32>
    %36 = vector.broadcast %13 : vector<1x16xf32> to vector<8x16xf32>
    %37 = arith.addf %35, %36 : vector<8x16xf32>
    %38 = vector.extract_strided_slice %37 {offsets = [0, 0], sizes = [8, 8], strides = [1, 1]} : vector<8x16xf32> to vector<8x8xf32>
    %39 = vector.extract_strided_slice %37 {offsets = [0, 8], sizes = [8, 8], strides = [1, 1]} : vector<8x16xf32> to vector<8x8xf32>
    %cst_25 = arith.constant 0.000000e+00 : f32
    %40 = vector.broadcast %cst_25 : f32 to vector<8x8xf32>
    %41 = arith.subf %40, %39 : vector<8x8xf32>
    %42 = math.exp %41 : vector<8x8xf32>
    %43 = arith.addf %42, %5 : vector<8x8xf32>
    %cst_26 = arith.constant 9.99999993E-9 : f32
    %44 = vector.broadcast %cst_26 : f32 to vector<8x8xf32>
    %45 = arith.addf %43, %44 : vector<8x8xf32>
    %46 = math.log %45 : vector<8x8xf32>
    %cst_27 = arith.constant 0.000000e+00 : f32
    %47 = vector.broadcast %cst_27 : f32 to vector<8x8xf32>
    %48 = arith.subf %47, %46 : vector<8x8xf32>
    %49 = arith.mulf %38, %42 : vector<8x8xf32>
    %50 = arith.mulf %4, %5 : vector<8x8xf32>
    %51 = arith.addf %49, %50 : vector<8x8xf32>
    %52 = arith.divf %51, %43 : vector<8x8xf32>
    %cst_28 = arith.constant 9.99999993E-9 : f32
    %53 = vector.broadcast %cst_28 : f32 to vector<8x8xf32>
    %54 = arith.addf %43, %53 : vector<8x8xf32>
    %55 = math.rsqrt %54 : vector<8x8xf32>
    %56 = arith.mulf %3, %55 : vector<8x8xf32>
    %57 = arith.addf %52, %56 : vector<8x8xf32>
    %58 = arith.truncf %57 : vector<8x8xf32> to vector<8x8xbf16>
    %cst_29 = arith.constant dense<0.000000e+00> : vector<8x16xf32>
    %59 = tpu.matmul %58, %9, %cst_29 {dimension_numbers = #tpu.dot_dimension_numbers<[1], [0], [0], [1], [0, 0, 1, 1], [], []>} : vector<8x8xbf16>, vector<8x16xbf16>, vector<8x16xf32> -> vector<8x16xf32>
    %60 = vector.broadcast %14 : vector<1x16xf32> to vector<8x16xf32>
    %61 = arith.addf %59, %60 : vector<8x16xf32>
    %cst_30 = arith.constant 0.000000e+00 : f32
    %62 = vector.broadcast %cst_30 : f32 to vector<8x16xf32>
    %63 = arith.maximumf %61, %62 : vector<8x16xf32>
    %64 = vector.extract_strided_slice %63 {offsets = [0, 0], sizes = [8, 8], strides = [1, 1]} : vector<8x16xf32> to vector<8x8xf32>
    %65 = vector.extract_strided_slice %63 {offsets = [0, 8], sizes = [8, 8], strides = [1, 1]} : vector<8x16xf32> to vector<8x8xf32>
    %66 = vector.broadcast %15 : vector<1x8xf32> to vector<8x8xf32>
    %67 = arith.mulf %64, %66 : vector<8x8xf32>
    %cst_31 = arith.constant dense<0.000000e+00> : vector<8xf32>
    %68 = vector.multi_reduction <add>, %67, %cst_31 [1] : vector<8x8xf32> to vector<8xf32>
    %69 = vector.shape_cast %68 : vector<8xf32> to vector<8x1xf32>
    %70 = vector.broadcast %17 : vector<1x1xf32> to vector<8x1xf32>
    %71 = arith.addf %69, %70 : vector<8x1xf32>
    %72 = vector.broadcast %16 : vector<1x8xf32> to vector<8x8xf32>
    %73 = arith.mulf %65, %72 : vector<8x8xf32>
    %cst_32 = arith.constant dense<0.000000e+00> : vector<8xf32>
    %74 = vector.multi_reduction <add>, %73, %cst_32 [1] : vector<8x8xf32> to vector<8xf32>
    %75 = vector.shape_cast %74 : vector<8xf32> to vector<8x1xf32>
    %76 = vector.broadcast %18 : vector<1x1xf32> to vector<8x1xf32>
    %77 = arith.addf %75, %76 : vector<8x1xf32>
    %cst_33 = arith.constant 0.000000e+00 : f32
    %78 = vector.broadcast %cst_33 : f32 to vector<8x1xf32>
    %79 = arith.subf %78, %71 : vector<8x1xf32>
    %80 = math.exp %79 : vector<8x1xf32>
    %cst_34 = arith.constant 1.000000e+00 : f32
    %81 = vector.broadcast %cst_34 : f32 to vector<8x1xf32>
    %82 = arith.addf %81, %80 : vector<8x1xf32>
    %83 = tpu.reciprocal %82 {approx = true} : vector<8x1xf32> -> vector<8x1xf32>
    %cst_35 = arith.constant 1.000000e+00 : f32
    %84 = vector.broadcast %cst_35 : f32 to vector<8x1xf32>
    %85 = arith.subf %84, %83 : vector<8x1xf32>
    %cst_36 = arith.constant 0.000000e+00 : f32
    %86 = vector.broadcast %cst_36 : f32 to vector<8x109xf32>
    %87 = tpu.concatenate %85, %83, %77, %52, %48, %86 in 1 : vector<8x1xf32>, vector<8x1xf32>, vector<8x1xf32>, vector<8x8xf32>, vector<8x8xf32>, vector<8x109xf32> -> vector<8x128xf32>
    %c0_37 = arith.constant 0 : index
    %c0_38 = arith.constant 0 : index
    %88 = vector.load %arg4[%c0_37, %c0_38] : memref<8x128xf32, #tpu.memory_space<vmem>>, vector<8x128xf32>
    tpu.vector_store %arg4[%c0_37, %c0_38], %87 {strides = array<i32>} : memref<8x128xf32, #tpu.memory_space<vmem>>, vector<8x128xf32>,
    return
  }
  func.func @transform_0(%arg0: i32) -> (i32, i32) {
    %c0_i32 = arith.constant 0 : i32
    %c0_i32_0 = arith.constant 0 : i32
    return %arg0, %c0_i32 : i32, i32
  }
  func.func @transform_1(%arg0: i32) -> (i32, i32) {
    %c0_i32 = arith.constant 0 : i32
    %c0_i32_0 = arith.constant 0 : i32
    %c0_i32_1 = arith.constant 0 : i32
    return %c0_i32, %c0_i32_0 : i32, i32
  }
  func.func @transform_2(%arg0: i32) -> (i32, i32) {
    %c0_i32 = arith.constant 0 : i32
    %c0_i32_0 = arith.constant 0 : i32
    %c0_i32_1 = arith.constant 0 : i32
    return %c0_i32, %c0_i32_0 : i32, i32
  }
  func.func @transform_3(%arg0: i32) -> (i32, i32) {
    %c0_i32 = arith.constant 0 : i32
    %c0_i32_0 = arith.constant 0 : i32
    return %arg0, %c0_i32 : i32, i32
  }
}

</mosaic_0001>

<bundles_post_ra>
// kernel: tpu_custom_call.1
= control target key start
LH: loop header
LB: loop body
LE: loop exit
PB: predicated region body
PF: predicated region fallthrough
CT: control target
= control target key end

     0   :  { %8 = vsyncpa [#allocation3], 0  ;;  %s564_s0 = inlined_call_operand.hbm [shape: f32[8,128], index: 0, kind: input, shape index: {}]   ;;  %s565_s1 = inlined_call_operand.hbm [shape: bf16[96,128], index: 1, kind: input, shape index: {}]   ;;  %s566_s2 = inlined_call_operand.hbm [shape: f32[8,128], index: 2, kind: input, shape index: {}]   ;;  %s567_s3 = inlined_call_operand.hbm [shape: f32[8,128], index: 3, kind: output, shape index: {}]  }
   0x1   :  { %9 = vsyncpa [#allocation6], 0  ;;  %s26_s14 = sshll.u32 %s565_s1, 4  ;;  %s27_s14 = int_to_ptr.hbm [resolvable:$true] %s26_s14 }
   0x2   :  { %10 = vsyncpa [#allocation4], 0  ;;  %s494_s15 = smov [#allocation5]   ;;  %s16_s19 = sshll.u32 %s564_s0, 4  ;;  %s17_s19 = int_to_ptr.hbm [resolvable:$true] %s16_s19 }
   0x3   :  { %s28_s16 = sshll.u32 %s494_s15, 4  ;;  %s495_s20 = smov 64   ;;  %s29_s16 = int_to_ptr.vmem [resolvable:$true] %s28_s16 }
   0x4   :  { %s496_s21 = smov 4   ;;  %s497_s22 = smov [#allocation2]  }
   0x5   :  { %34 = dma.hbm_to_vmem [thread:$0]  %s27_s14, 768, %s29_s16, [#allocation6], %s495_s20, %s495_s20, %s496_s21  }
   0x6   :  { %s18_s23 = sshll.u32 %s497_s22, 4  ;;  %s40_s26 = sshll.u32 %s566_s2, 4  ;;  %s19_s23 = int_to_ptr.vmem [resolvable:$true] %s18_s23  ;;  %s41_s26 = int_to_ptr.hbm [resolvable:$true] %s40_s26 }
   0x7   :  { %21 = dma.hbm_to_vmem [thread:$0]  %s17_s19, 128, %s19_s23, [#allocation3]  }
   0x8   :  { %s498_s1 = smov [#allocation7]  }
   0x9   :  { %s42_s27 = sshll.u32 %s498_s1, 4  ;;  %s43_s27 = int_to_ptr.vmem [resolvable:$true] %s42_s27 }
   0xa   :  { %45 = dma.hbm_to_vmem [thread:$0]  %s41_s26, 128, %s43_s27, [#allocation6]  }
   0xb   :  { %488 = dma.done.wait [#allocation3], 128  }
   0xc   :  { %489 = vsyncadd [#allocation3], 4294967168 }
   0xd   :  { %490 = dma.done.wait [#allocation6], 896  }
   0xe   :  { %491 = vsyncadd [#allocation6], 4294966400  ;;  %v499_v0 = vmov 32   ;;  %v355_v1 = vld [vmem:[#allocation5 + $0x8] sm:$0xff]  ;;  %v537_v2 = vld [vmem:[#allocation2] sm:$0xff]  ;;  %vm97_vm0 = vcmask 261120  }
   0xf   :  { %373 = vset.pattern.permute.xlu0 %v499_v0  ;;  %v354_v3 = vld [vmem:[#allocation5] sm:$0xff]  ;;  %107 = vmatpush.bf16.msra.mxu0 %v355_v1  ;;  %v60_v4 = vpack.c.bf16 %v537_v2, %v537_v2  ;;  %v357_v5 = vld [vmem:[#allocation5 + $0x18] sm:$0xff]  ;;  %v356_v6 = vld [vmem:[#allocation5 + $0x10] sm:$0xff]  ;;  %s500_s0 = smov 120   ;;  %s501_s2 = smov 80   ;;  %vm156_vm1 = vcmask 130048  }
  0x10   :  { %80 = vperm.xlu0 %373, %v537_v2   ;;  %140 = vmatpush.bf16.msra.mxu1 %v357_v5  ;;  %v374_v7 = vld [vmem:[#allocation7] ss:$0 sm:$0xff]  ;;  %v375_v10 = vld [vmem:[#allocation7 + $0x1] ss:$0 sm:$0xff]  ;;  %v358_v17 = vld [vmem:[#allocation5 + $0x20] sm:$0xff]  ;;  %s502_s28 = smov 32  }
  0x11   :  { %189 = vrot.lane.b32.xlu1 %v537_v2, %s500_s0  ;;  %167 = vmatpush.bf16.msra.mxu2 %v358_v17  ;;  %v376_v20 = vld [vmem:[#allocation7 + $0x2] ss:$0 sm:$0xff]  ;;  %v377_v26 = vld [vmem:[#allocation7 + $0x3] ss:$0 sm:$0xff]  ;;  %s503_s29 = smov 88   ;;  %vm243_vm5 = vcmask 1043456  }
  0x12   :  { %v71_v46 = vld [vmem:[#allocation5 + $0x28] sm:$0xf]  ;;  %vm239_vm10 = vcmask 64512   ;;  %v379_v5 = vld [vmem:[#allocation7 + $0x5] ss:$0 sm:$0xff]  ;;  %s504_s30 = smov 3  }
  0x13   :  { %108 = vmatpush.bf16.msra.mxu0 %v354_v3  ;;  %v245_v47 = vsel %vm243_vm5, %v71_v46, 0  ;;  %s505_s4 = smov 113   ;;  %s506_s5 = smov 112   ;;  %vm301_vm11 = vcmask 7168   ;;  %vm303_vm12 = vcmask 15360   ;;  %vm305_vm13 = vcmask 23552  }
  0x14   :  { %141 = vmatpush.bf16.msra.mxu1 %v356_v6  ;;  %254 = vmatpush.bf16.msra.mxu3 %v245_v47  ;;  %vm307_vm14 = vcmask 89088   ;;  %s507_s6 = smov [#allocation8]   ;;  %s319_s10 = sshll.u32 %s567_s3, 4  ;;  %vm309_vm15 = vcmask 154624   ;;  %s320_s10 = int_to_ptr.hbm [resolvable:$true] %s319_s10 }
  0x15   :  { %s317_s7 = sshll.u32 %s507_s6, 4  ;;  %s318_s7 = int_to_ptr.vmem [resolvable:$true] %s317_s7 }
  0x16   :  { %338 = vmatmul.msk.bf16.vlgmr.msra.gmra.mxu0 %vm97_vm0, %v60_v4 }
  0x18   :  { %176 = vrot.lane.b32.xlu0 %v537_v2, %s501_s2 }
  0x82   :  { %v81_v8 = vpop.permute.xlu0 %80 }
  0x83   :  { %v84_v9 = vmul.f32 %v374_v7, %v81_v8  ;;  %v190_v18 = vpop.permute.xlu1 %189 }
  0x84   :  { %v192_v19 = vmul.f32 %v190_v18, %v537_v2 }
  0x86   :  { %194 = vrot.lane.b32.xlu0 %v192_v19, %s501_s2 }
  0x8a   :  { %v177_v32 = vpop.permute.xlu0 %176 }
  0x93   :  { %v110_v11 = vpop.f32.mrf.mxu0 }
  0x94   :  { %v111_v12 = vadd.f32 %v110_v11, %v84_v9 }
  0x96   :  { %v115_v13 = vadd.f32 %v375_v10, %v111_v12 }
  0x98   :  { %v116_v14 = vmax.f32 %v115_v13, 0.0 }
  0x9a   :  { %v117_v15 = vpack.c.bf16 %v116_v14, %v116_v14 }
  0x9b   :  { %v112_v16 = vpop.f32.mrf.mxu0 }
  0x9c   :  { %347 = vmatmul.msk.bf16.vlgmr.msra.gmra.mxu1 %vm97_vm0, %v117_v15 }
  0xf8   :  { %v195_v58 = vpop.permute.xlu0 %194 }
 0x119   :  { %v143_v21 = vpop.f32.mrf.mxu1 }
 0x11a   :  { %v144_v22 = vadd.f32 %v376_v20, %v143_v21 }
 0x11c   :  { %v147_v23 = vmax.f32 %v144_v22, 0.0 }
 0x11e   :  { %v148_v24 = vpack.c.bf16 %v147_v23, %v147_v23 }
 0x120   :  { %352 = vmatmul.msk.bf16.vlgmr.msra.gmra.mxu2 %vm156_vm1, %v148_v24 }
 0x121   :  { %v145_v25 = vpop.f32.mrf.mxu1 }
 0x1a3   :  { %v169_v27 = vpop.f32.mrf.mxu2 }
 0x1a4   :  { %v170_v28 = vadd.f32 %v377_v26, %v169_v27 }
 0x1a6   :  { %v173_v29 = vsub.f32 0.0, %v170_v28 }
 0x1a8   :  { %v174_v30 = vmul.f32 1.442695, %v173_v29 }
 0x1aa   :  { %380 = vpow2.f32 %v174_v30 }
 0x1ab   :  { %v171_v31 = vpop.f32.mrf.mxu2 }
 0x1b0   :  { %v381_v33 = vpop.eup %380 }
 0x1b1   :  { %v179_v34 = vadd.f32 %v381_v33, %v177_v32 }
 0x1b3   :  { %v548_v35 = vadd.f32 1e-08, %v179_v34  ;;  %199 = vrot.lane.b32.xlu2 %v179_v34, %s500_s0 }
 0x1b5   :  { %382 = vrsqrt.f32 %v548_v35  ;;  %vm223_vm3 = vweird.f32 %v548_v35 }
 0x1bb   :  { %v383_v36 = vpop.eup %382  ;;  %185 = vrot.lane.b32.xlu2 %v381_v33, %s500_s0 }
 0x1bc   :  { %v218_v37 = vmul.f32 %v383_v36, %v548_v35  ;;  %vm224_vm2 = vweird.f32 %v383_v36 }
 0x1bd   :  { %vm225_vm4 = vmor %vm223_vm3, %vm224_vm2 }
 0x1be   :  { %v219_v38 = vmul.f32 %v383_v36, %v218_v37 }
 0x1c0   :  { %v220_v39 = vmul.f32 0.5, %v219_v38 }
 0x1c2   :  { %v221_v40 = vsub.f32 1.5, %v220_v39 }
 0x1c4   :  { %v222_v41 = vmul.f32 %v383_v36, %v221_v40 }
 0x1c6   :  { %v226_v42 = vsel %vm225_vm4, %v383_v36, %v222_v41 }
 0x1c7   :  { %228 = vrot.lane.b32.xlu1 %v226_v42, %s502_s28 }
 0x20d   :  { %v200_v45 = vpop.permute.xlu2 %199 }
 0x20e   :  { %384 = vrcp.f32 %v200_v45  ;;  %v213_v54 = vand.u32 2147483648, %v200_v45  ;;  %vm207_vm7 = vweird.f32 %v200_v45  ;;  %v211_v55 = vand.u32 2147483647, %v200_v45 }
 0x210   :  { %v214_v59 = vor.u32 1.1754944e-38, %v213_v54  ;;  %vm212_vm9 = vcmp.eq.f32.partialorder %v211_v55, 8.507059e+37 }
 0x214   :  { %v385_v48 = vpop.eup %384 }
 0x215   :  { %v203_v49 = vmul.f32 %v385_v48, %v200_v45  ;;  %vm208_vm6 = vweird.f32 %v385_v48  ;;  %v186_v53 = vpop.permute.xlu2 %185 }
 0x216   :  { %vm209_vm8 = vmor %vm207_vm7, %vm208_vm6  ;;  %v188_v56 = vmul.f32 %v186_v53, %v170_v28 }
 0x217   :  { %v204_v50 = vsub.f32 1.0, %v203_v49 }
 0x218   :  { %v197_v61 = vadd.f32 %v195_v58, %v188_v56 }
 0x219   :  { %v205_v51 = vmul.f32 %v385_v48, %v204_v50 }
 0x21b   :  { %v206_v52 = vadd.f32 %v385_v48, %v205_v51 }
 0x21d   :  { %v210_v57 = vsel %vm209_vm8, %v385_v48, %v206_v52 }
 0x21e   :  { %v215_v60 = vsel %vm212_vm9, %v214_v59, %v210_v57 }
 0x21f   :  { %v216_v62 = vmul.f32 %v215_v60, %v197_v61 }
 0x239   :  { %v229_v43 = vpop.permute.xlu1 %228 }
 0x23a   :  { %v231_v44 = vmul.f32 %v229_v43, %v537_v2  ;;  %v378_v2 = vld [vmem:[#allocation7 + $0x4] ss:$0 sm:$0xff] }
 0x23c   :  { %233 = vrot.lane.b32.xlu1 %v231_v44, %s503_s29 }
 0x2ae   :  { %v234_v63 = vpop.permute.xlu1 %233 }
 0x2af   :  { %v236_v0 = vadd.f32 %v234_v63, %v216_v62 }
 0x2b1   :  { %v237_v1 = vpack.c.bf16 %v236_v0, %v236_v0 }
 0x2b3   :  { %353 = vmatmul.msk.bf16.vlgmr.msra.gmra.mxu3 %vm239_vm10, %v237_v1 }
 0x336   :  { %v256_v3 = vpop.f32.mrf.mxu3 }
 0x337   :  { %v257_v4 = vadd.f32 %v378_v2, %v256_v3 }
 0x339   :  { %v260_v6 = vmax.f32 %v257_v4, 0.0 }
 0x33b   :  { %v262_v7 = vmul.f32 %v379_v5, %v260_v6 }
 0x33d   :  { %268 = vrot.lane.b32.xlu2 %v262_v7, %s500_s0  ;;  %v263_v8 = vsel %vm239_vm10, %v262_v7, 0.0 }
 0x33e   :  { %v258_v9 = vpop.f32.mrf.mxu3  ;;  %264 = vadd.xlane.f32.xlu0 %v263_v8 }
 0x345   :  { %294 = vrot.lane.b32.xlu2 %v216_v62, %s504_s30 }
 0x397   :  { %v269_v10 = vpop.permute.xlu2 %268 }
 0x398   :  { %v271_v11 = vsel %vm239_vm10, %v269_v10, 0.0 }
 0x399   :  { %272 = vadd.xlane.f32.xlu1 %v271_v11 }
 0x39f   :  { %v295_v25 = vpop.permute.xlu2 %294 }
 0x3b1   :  { %v265_v12 = vpop.xlane.xlu0 %264 }
 0x3b2   :  { %v266_v13 = vadd.f32 %v379_v5, %v265_v12 }
 0x3b4   :  { %v275_v14 = vsub.f32 0.0, %v266_v13 }
 0x3b6   :  { %v276_v15 = vmul.f32 1.442695, %v275_v14 }
 0x3b8   :  { %386 = vpow2.f32 %v276_v15 }
 0x3be   :  { %v387_v16 = vpop.eup %386 }
 0x3bf   :  { %v278_v17 = vadd.f32 1.0, %v387_v16 }
 0x3c1   :  { %388 = vrcp.f32 %v278_v17 }
 0x3c2   :  { %390 = vlog2.f32 %v548_v35 }
 0x3c7   :  { %v389_v18 = vpop.eup %388 }
 0x3c8   :  { %286 = vrot.lane.b32.xlu2 %v389_v18, %s505_s4  ;;  %v280_v19 = vsub.f32 1.0, %v389_v18  ;;  %v391_v22 = vpop.eup %390 }
 0x3c9   :  { %v182_v23 = vmul.f32 0.6931472, %v391_v22 }
 0x3cb   :  { %v183_v24 = vsub.f32 0.0, %v182_v23 }
 0x3d0   :  { %282 = vrot.lane.b32.xlu2 %v280_v19, %s506_s5 }
 0x40c   :  { %v273_v20 = vpop.xlane.xlu1 %272 }
 0x40d   :  { %v274_v21 = vadd.f32 %v379_v5, %v273_v20 }
 0x40f   :  { %290 = vrot.lane.b32.xlu2 %v274_v21, %s505_s4 }
 0x417   :  { %298 = vrot.lane.b32.xlu2 %v183_v24, %s504_s30 }
 0x422   :  { %v287_v26 = vpop.permute.xlu2 %286 }
 0x42a   :  { %v283_v27 = vpop.permute.xlu2 %282 }
 0x42b   :  { %v302_v29 = vsel %vm301_vm11, %v283_v27, %v287_v26 }
 0x469   :  { %v291_v28 = vpop.permute.xlu2 %290 }
 0x46a   :  { %v304_v30 = vsel %vm303_vm12, %v302_v29, %v291_v28 }
 0x46b   :  { %v306_v31 = vsel %vm305_vm13, %v304_v30, %v295_v25 }
 0x471   :  { %v299_v32 = vpop.permute.xlu2 %298 }
 0x472   :  { %v308_v33 = vsel %vm307_vm14, %v306_v31, %v299_v32 }
 0x473   :  { %v310_v34 = vsel %vm309_vm15, %v308_v33, 0.0 }
 0x474   :  { %311 = vst [vmem:[#allocation8] sm:$0xff] %v310_v34 }
 0x475   :  { %322 = dma.vmem_to_hbm [thread:$0]  %s318_s7, 128, %s320_s10, [#allocation4]  }
 0x476   :  { %492 = dma.done.wait [#allocation4], 128  }
 0x477   :  { %493 = vsyncadd [#allocation4], 4294967168 }
 0x478   :  { %327 = vsyncpa [#allocation3], 1 }
 0x479   :  { %328 = vsyncpa [#allocation6], 1 }
 0x47a   :  { %329 = vsyncpa [#allocation4], 1 }

</bundles_post_ra>
